<compile_context>
chip_gen: v7x
topology: tpu7x:2x2x1
jax: 0.10.0
libtpu: 0.0.40
codegen_flags: <defaults>
</compile_context>

<pallas_src>
import functools

import jax
import jax.numpy as jnp
from jax import lax
from jax.experimental import pallas as pl
from jax.experimental.pallas import tpu as pltpu


def _round_up(x, m):
    return (x + m - 1) // m * m


# ---------------------------------------------------------------------------
# Kernel
# ---------------------------------------------------------------------------
def _cve_kernel(x_ref, vec_ref, w2_ref, o_ref, *, max_value, eps, d_real):
    """One row-tile of the ContinuousValueEncoder forward pass.

    x_ref:   (TM, 1)  f32 input rows (flattened batch*seq)
    vec_ref: (5, Dp)  f32 folded vectors [w1; b1; b2; gamma; beta]
    w2_ref:  (Dp, Dp) second linear weight (right-multiply, zero-padded)
    o_ref:   (TM, Dp) output tile
    """
    v = vec_ref[...]
    w1, b1 = v[0:1, :], v[1:2, :]
    b2, gamma, beta = v[2:3, :], v[3:4, :], v[4:5, :]

    cdt = w2_ref.dtype  # compute dtype for linear1/ReLU (bf16 fast path / f32)

    # clamp(max=max_value); no lower clamp, matching torch.clamp(max=...).
    x = jnp.minimum(x_ref[...].astype(jnp.float32), jnp.float32(max_value))

    # linear1 (in_features=1) as a VPU rank-1 broadcast, directly in cdt.
    h = jnp.maximum(x.astype(cdt) * w1.astype(cdt) + b1.astype(cdt), 0)

    # linear2 on the MXU with f32 accumulation.
    h = jnp.dot(h, w2_ref[...], preferred_element_type=jnp.float32) + b2

    # LayerNorm over the real d_model columns.  Padded columns of h are exactly
    # zero (w1/b1/b2 and w2's padded rows/cols are zero), so full-width sums
    # equal sums over the real columns; one sweep gives mean and E[h^2].
    inv_d = jnp.float32(1.0 / d_real)
    mean = jnp.sum(h, axis=-1, keepdims=True) * inv_d
    ex2 = jnp.sum(h * h, axis=-1, keepdims=True) * inv_d
    var = jnp.maximum(ex2 - mean * mean, 0.0)
    out = (h - mean) * lax.rsqrt(var + eps) * gamma + beta

    # Dropout: identity (inference mode).
    o_ref[...] = out.astype(o_ref.dtype)


# ---------------------------------------------------------------------------
# Parameter packing (do once per model, reuse across calls)
# ---------------------------------------------------------------------------
def pack_params(params, *, matmul_dtype=jnp.bfloat16):
    """Pack/pad parameters into kernel operands (hoisted out of the call path).

    params: dict with
      w1 (1, D), b1 (D,), w2 (D, D) [right-multiply convention, i.e. torch
      linear2.weight.T], b2 (D,), gamma (D,), beta (D,).
    """
    D = params["w2"].shape[0]
    Dp = _round_up(D, 128)                       # lane-dense output stores

    w2 = jnp.zeros((Dp, Dp), jnp.float32).at[:D, :D].set(
        jnp.asarray(params["w2"], jnp.float32)).astype(matmul_dtype)

    def pad_vec(v):
        v = jnp.asarray(v, jnp.float32).reshape(1, D)
        return jnp.pad(v, ((0, 0), (0, Dp - D)))

    vecs = jnp.concatenate([pad_vec(params["w1"]), pad_vec(params["b1"]),
                            pad_vec(params["b2"]), pad_vec(params["gamma"]),
                            pad_vec(params["beta"])], axis=0)       # (5, Dp)

    return {"vecs": vecs, "w2": w2, "d_model": D, "d_pad": Dp,
            "matmul_dtype": jnp.dtype(matmul_dtype)}


# ---------------------------------------------------------------------------
# Tiling / VMEM sizing
# ---------------------------------------------------------------------------
def _vmem_budget_bytes():
    """~75% of per-core VMEM capacity (generation-aware; v7x-safe fallback)."""
    try:
        cap = int(pltpu.get_tpu_info().vmem_capacity_bytes)
    except Exception:                       # no TPU info -> assume 64 MiB (v7x)
        cap = 64 << 20
    return cap * 3 // 4


def _per_row_bytes(d_pad, w2_itemsize, out_itemsize):
    # Double-buffered output & x blocks + kernel intermediates
    # (h in matmul dtype, f32 matmul result, f32 LayerNorm temporaries).
    return (2 * d_pad * out_itemsize + 2 * 4
            + d_pad * w2_itemsize + 2 * d_pad * 4)


def _choose_row_tile(n_rows, d_pad, w2_itemsize, out_itemsize, budget):
    """Row tile sized against VMEM (incl. intermediates), a ~2 MiB output
    block, and >= ~8 grid steps when there is enough work."""
    fixed = d_pad * d_pad * w2_itemsize + 8 * d_pad * 4 + (1 << 20)
    per_row = _per_row_bytes(d_pad, w2_itemsize, out_itemsize)
    cap_vmem = max(budget - fixed, 8 * per_row) // per_row
    cap_block = max(8, (2 << 20) // (d_pad * out_itemsize))   # ~2 MiB out block
    cap = int(min(1024, cap_vmem, cap_block, _round_up(n_rows, 8)))
    if n_rows >= 64:                 # keep >= ~8 steps (megacore / pipelining)
        cap = min(cap, max(8, (n_rows // 8) // 8 * 8))
    cap = max(8, cap // 8 * 8)

    tile = cap
    if n_rows % 8 == 0:
        # Prefer a tile that divides n_rows exactly (no row padding, no
        # post-kernel row-slice copy) unless it explodes the step count >4x.
        t = cap
        while t >= 8 and n_rows % t != 0:
            t -= 8
        if t >= max(8, cap // 4):
            tile = t
    return tile, fixed, per_row


# ---------------------------------------------------------------------------
# Wrapper
# ---------------------------------------------------------------------------
def continuous_value_encoder(x, params=None, *, packed=None, max_value=255,
                             eps=1e-5, row_tile=None,
                             matmul_dtype=jnp.bfloat16,
                             out_dtype=jnp.float32):
    """x: (B, S).  Returns (B, S, D) in out_dtype.

    Pass packed=pack_params(params, ...) to amortize parameter packing across
    calls; otherwise params is packed on every call.
    """
    if packed is None:
        packed = pack_params(params, matmul_dtype=matmul_dtype)
    vecs, w2 = packed["vecs"], packed["w2"]
    D, Dp = packed["d_model"], packed["d_pad"]
    w2_itemsize = packed["matmul_dtype"].itemsize
    out_dtype = jnp.dtype(out_dtype)

    B, S = x.shape
    N = B * S
    budget = _vmem_budget_bytes()

    if row_tile is None:
        row_tile, fixed, per_row = _choose_row_tile(
            N, Dp, w2_itemsize, out_dtype.itemsize, budget)
    else:
        row_tile = max(8, _round_up(int(row_tile), 8))
        fixed = Dp * Dp * w2_itemsize + 8 * Dp * 4 + (1 << 20)
        per_row = _per_row_bytes(Dp, w2_itemsize, out_dtype.itemsize)

    N_pad = _round_up(N, row_tile)
    x_rows = x.reshape(N, 1).astype(jnp.float32)
    if N_pad != N:
        x_rows = jnp.pad(x_rows, ((0, N_pad - N), (0, 0)))

    kernel = functools.partial(_cve_kernel, max_value=max_value, eps=eps,
                               d_real=D)
    # Extra Dp^2 term leaves room in case the single-buffer request is ignored.
    vmem_need = fixed + Dp * Dp * w2_itemsize + row_tile * per_row
    vmem_limit = int(max(min(budget, vmem_need + (4 << 20)), 16 << 20))

    def _run(single_buffer_consts):
        const_kw = ({"pipeline_mode": pl.Buffered(1)}
                    if single_buffer_consts else {})
        return pl.pallas_call(
            kernel,
            out_shape=jax.ShapeDtypeStruct((N_pad, Dp), out_dtype),
            grid_spec=pltpu.PrefetchScalarGridSpec(
                num_scalar_prefetch=0,
                grid=(N_pad // row_tile,),
                in_specs=[
                    pl.BlockSpec((row_tile, 1), lambda i: (i, 0)),        # x rows
                    pl.BlockSpec((5, Dp), lambda i: (0, 0), **const_kw),  # vectors
                    pl.BlockSpec((Dp, Dp), lambda i: (0, 0), **const_kw), # w2
                ],
                out_specs=pl.BlockSpec((row_tile, Dp), lambda i: (i, 0)),
            ),
            compiler_params=pltpu.CompilerParams(
                dimension_semantics=("parallel",),
                vmem_limit_bytes=vmem_limit),
        )(x_rows, vecs, w2)

    try:
        out = _run(True)
    except Exception:
        # pl.Buffered(1) unsupported on this jax version -> default buffering.
        out = _run(False)

    # Skip the post-kernel slice copy whenever no padding was introduced.
    if N_pad == N and Dp == D:
        return out.reshape(B, S, D)
    return out[:N, :D].reshape(B, S, D)


# ---------------------------------------------------------------------------
# Test harness
# ---------------------------------------------------------------------------
def init_params(key, d_model):
    """Deterministic synthetic init mimicking nn.Linear / nn.LayerNorm shapes."""
    k1, k2, k3, k4 = jax.random.split(key, 4)
    bound1 = 1.0  # 1/sqrt(in_features=1)
    w1 = jax.random.uniform(k1, (1, d_model), jnp.float32, -bound1, bound1)
    b1 = jax.random.uniform(k2, (d_model,), jnp.float32, -bound1, bound1)
    bound2 = 1.0 / jnp.sqrt(d_model)
    w2 = jax.random.uniform(k3, (d_model, d_model), jnp.float32, -bound2, bound2)
    b2 = jax.random.uniform(k4, (d_model,), jnp.float32, -bound2, bound2)
    gamma = jnp.ones((d_model,), jnp.float32)
    beta = jnp.zeros((d_model,), jnp.float32)
    return {"w1": w1, "b1": b1, "w2": w2, "b2": b2, "gamma": gamma, "beta": beta}


def _reference(x, params, max_value=255, eps=1e-5):
    x = jnp.minimum(x.astype(jnp.float32), max_value)[..., None]
    h = x @ params["w1"] + params["b1"]
    h = jnp.maximum(h, 0.0)
    h = h @ params["w2"] + params["b2"]
    mean = jnp.mean(h, axis=-1, keepdims=True)
    var = jnp.mean((h - mean) ** 2, axis=-1, keepdims=True)
    h = (h - mean) * lax.rsqrt(var + eps)
    return h * params["gamma"] + params["beta"]


if __name__ == "__main__":
    key = jax.random.PRNGKey(0)
    k_in, k_param = jax.random.split(key)

    batch, seq, d_model = 2, 8, 32
    # values in a range that exercises clamping at max_value=255
    x = jax.random.uniform(k_in, (batch, seq), jnp.float32, 0.0, 400.0)
    params = init_params(k_param, d_model)
    ref = _reference(x, params)

    # Exact-precision path (f32 matmul): tight tolerance (one-sweep variance
    # introduces a small amount of cancellation vs. the two-pass reference).
    packed_f32 = pack_params(params, matmul_dtype=jnp.float32)
    out_f32 = jax.block_until_ready(
        continuous_value_encoder(x, packed=packed_f32, max_value=255))
    assert out_f32.shape == (batch, seq, d_model)
    assert jnp.allclose(out_f32, ref, atol=1e-3, rtol=1e-3), "f32 mismatch vs reference"

    # Default fast path (bf16 linear1 + bf16 MXU matmul, f32 accumulation).
    packed_bf16 = pack_params(params, matmul_dtype=jnp.bfloat16)
    out_bf16 = jax.block_until_ready(
        continuous_value_encoder(x, packed=packed_bf16, max_value=255))
    assert out_bf16.shape == (batch, seq, d_model)
    assert jnp.allclose(out_bf16, ref, atol=5e-2, rtol=5e-2), "bf16 mismatch vs reference"

    print("KERNEL_OK")
</pallas_src>

<mosaic_0001>
module attributes {stable_mosaic.version = 11 : i64} {
  func.func @_cve_kernel(%arg0: i32, %arg1: memref<16x1xf32, #tpu.memory_space<vmem>>, %arg2: memref<5x128xf32, #tpu.memory_space<vmem>>, %arg3: memref<128x128xf32, #tpu.memory_space<vmem>>, %arg4: memref<16x128xf32, #tpu.memory_space<vmem>>) attributes {dimension_semantics = [#tpu.dimension_semantics<parallel>], iteration_bounds = array<i64: 1>, scalar_prefetch = 0 : i64, scratch_operands = 0 : i64, tpu.core_type = #tpu.core_type<tc>, window_params = [{transform_indices = @transform_0, window_bounds = array<i64: 16, 1>}, {pipeline_mode = #tpu.pipeline_mode<synchronous>, transform_indices = @transform_1, window_bounds = array<i64: 5, 128>}, {pipeline_mode = #tpu.pipeline_mode<synchronous>, transform_indices = @transform_2, window_bounds = array<i64: 128, 128>}, {transform_indices = @transform_3, window_bounds = array<i64: 16, 128>}]} {
    %c0 = arith.constant 0 : index
    %c0_0 = arith.constant 0 : index
    %0 = vector.load %arg2[%c0, %c0_0] : memref<5x128xf32, #tpu.memory_space<vmem>>, vector<5x128xf32>
    %1 = vector.extract_strided_slice %0 {offsets = [0, 0], sizes = [1, 128], strides = [1, 1]} : vector<5x128xf32> to vector<1x128xf32>
    %2 = vector.extract_strided_slice %0 {offsets = [1, 0], sizes = [1, 128], strides = [1, 1]} : vector<5x128xf32> to vector<1x128xf32>
    %3 = vector.extract_strided_slice %0 {offsets = [2, 0], sizes = [1, 128], strides = [1, 1]} : vector<5x128xf32> to vector<1x128xf32>
    %4 = vector.extract_strided_slice %0 {offsets = [3, 0], sizes = [1, 128], strides = [1, 1]} : vector<5x128xf32> to vector<1x128xf32>
    %5 = vector.extract_strided_slice %0 {offsets = [4, 0], sizes = [1, 128], strides = [1, 1]} : vector<5x128xf32> to vector<1x128xf32>
    %c0_1 = arith.constant 0 : index
    %c0_2 = arith.constant 0 : index
    %6 = vector.load %arg1[%c0_1, %c0_2] : memref<16x1xf32, #tpu.memory_space<vmem>>, vector<16x1xf32>
    %cst = arith.constant 2.550000e+02 : f32
    %7 = vector.broadcast %cst : f32 to vector<16x1xf32>
    %8 = arith.minimumf %6, %7 : vector<16x1xf32>
    %9 = vector.broadcast %8 : vector<16x1xf32> to vector<16x128xf32>
    %10 = vector.broadcast %1 : vector<1x128xf32> to vector<16x128xf32>
    %11 = arith.mulf %9, %10 : vector<16x128xf32>
    %12 = vector.broadcast %2 : vector<1x128xf32> to vector<16x128xf32>
    %13 = arith.addf %11, %12 : vector<16x128xf32>
    %cst_3 = arith.constant 0.000000e+00 : f32
    %14 = vector.broadcast %cst_3 : f32 to vector<16x128xf32>
    %15 = arith.maximumf %13, %14 : vector<16x128xf32>
    %c0_4 = arith.constant 0 : index
    %c0_5 = arith.constant 0 : index
    %16 = vector.load %arg3[%c0_4, %c0_5] : memref<128x128xf32, #tpu.memory_space<vmem>>, vector<128x128xf32>
    %cst_6 = arith.constant dense<0.000000e+00> : vector<16x128xf32>
    %17 = tpu.matmul %15, %16, %cst_6 {dimension_numbers = #tpu.dot_dimension_numbers<[1], [0], [0], [1], [0, 0, 1, 1], [], []>} : vector<16x128xf32>, vector<128x128xf32>, vector<16x128xf32> -> vector<16x128xf32>
    %18 = vector.broadcast %3 : vector<1x128xf32> to vector<16x128xf32>
    %19 = arith.addf %17, %18 : vector<16x128xf32>
    %cst_7 = arith.constant dense<0.000000e+00> : vector<16xf32>
    %20 = vector.multi_reduction <add>, %19, %cst_7 [1] : vector<16x128xf32> to vector<16xf32>
    %21 = vector.shape_cast %20 : vector<16xf32> to vector<16x1xf32>
    %cst_8 = arith.constant 3.125000e-02 : f32
    %22 = vector.broadcast %cst_8 : f32 to vector<16x1xf32>
    %23 = arith.mulf %21, %22 : vector<16x1xf32>
    %24 = arith.mulf %19, %19 : vector<16x128xf32>
    %cst_9 = arith.constant dense<0.000000e+00> : vector<16xf32>
    %25 = vector.multi_reduction <add>, %24, %cst_9 [1] : vector<16x128xf32> to vector<16xf32>
    %26 = vector.shape_cast %25 : vector<16xf32> to vector<16x1xf32>
    %cst_10 = arith.constant 3.125000e-02 : f32
    %27 = vector.broadcast %cst_10 : f32 to vector<16x1xf32>
    %28 = arith.mulf %26, %27 : vector<16x1xf32>
    %29 = arith.mulf %23, %23 : vector<16x1xf32>
    %30 = arith.subf %28, %29 : vector<16x1xf32>
    %cst_11 = arith.constant 0.000000e+00 : f32
    %31 = vector.broadcast %cst_11 : f32 to vector<16x1xf32>
    %32 = arith.maximumf %30, %31 : vector<16x1xf32>
    %33 = vector.broadcast %23 : vector<16x1xf32> to vector<16x128xf32>
    %34 = arith.subf %19, %33 : vector<16x128xf32>
    %cst_12 = arith.constant 9.99999974E-6 : f32
    %35 = vector.broadcast %cst_12 : f32 to vector<16x1xf32>
    %36 = arith.addf %32, %35 : vector<16x1xf32>
    %37 = math.rsqrt %36 : vector<16x1xf32>
    %38 = vector.broadcast %37 : vector<16x1xf32> to vector<16x128xf32>
    %39 = arith.mulf %34, %38 : vector<16x128xf32>
    %40 = vector.broadcast %4 : vector<1x128xf32> to vector<16x128xf32>
    %41 = arith.mulf %39, %40 : vector<16x128xf32>
    %42 = vector.broadcast %5 : vector<1x128xf32> to vector<16x128xf32>
    %43 = arith.addf %41, %42 : vector<16x128xf32>
    %c0_13 = arith.constant 0 : index
    %c0_14 = arith.constant 0 : index
    %44 = vector.load %arg4[%c0_13, %c0_14] : memref<16x128xf32, #tpu.memory_space<vmem>>, vector<16x128xf32>
    tpu.vector_store %arg4[%c0_13, %c0_14], %43 {strides = array<i32>} : memref<16x128xf32, #tpu.memory_space<vmem>>, vector<16x128xf32>,
    return
  }
  func.func @transform_0(%arg0: i32) -> (i32, i32) {
    %c0_i32 = arith.constant 0 : i32
    %c0_i32_0 = arith.constant 0 : i32
    return %arg0, %c0_i32 : i32, i32
  }
  func.func @transform_1(%arg0: i32) -> (i32, i32) {
    %c0_i32 = arith.constant 0 : i32
    %c0_i32_0 = arith.constant 0 : i32
    %c0_i32_1 = arith.constant 0 : i32
    return %c0_i32, %c0_i32_0 : i32, i32
  }
  func.func @transform_2(%arg0: i32) -> (i32, i32) {
    %c0_i32 = arith.constant 0 : i32
    %c0_i32_0 = arith.constant 0 : i32
    %c0_i32_1 = arith.constant 0 : i32
    return %c0_i32, %c0_i32_0 : i32, i32
  }
  func.func @transform_3(%arg0: i32) -> (i32, i32) {
    %c0_i32 = arith.constant 0 : i32
    %c0_i32_0 = arith.constant 0 : i32
    return %arg0, %c0_i32 : i32, i32
  }
}

module attributes {stable_mosaic.version = 11 : i64} {
  func.func @_cve_kernel(%arg0: i32, %arg1: memref<16x1xf32, #tpu.memory_space<vmem>>, %arg2: memref<5x128xf32, #tpu.memory_space<vmem>>, %arg3: memref<128x128xf32, #tpu.memory_space<vmem>>, %arg4: memref<16x128xf32, #tpu.memory_space<vmem>>) attributes {dimension_semantics = [#tpu.dimension_semantics<parallel>], iteration_bounds = array<i64: 1>, scalar_prefetch = 0 : i64, scratch_operands = 0 : i64, tpu.core_type = #tpu.core_type<tc>, window_params = [{transform_indices = @transform_0, window_bounds = array<i64: 16, 1>}, {pipeline_mode = #tpu.pipeline_mode<synchronous>, transform_indices = @transform_1, window_bounds = array<i64: 5, 128>}, {pipeline_mode = #tpu.pipeline_mode<synchronous>, transform_indices = @transform_2, window_bounds = array<i64: 128, 128>}, {transform_indices = @transform_3, window_bounds = array<i64: 16, 128>}]} {
    %c0 = arith.constant 0 : index
    %c0_0 = arith.constant 0 : index
    %0 = vector.load %arg2[%c0, %c0_0] : memref<5x128xf32, #tpu.memory_space<vmem>>, vector<5x128xf32>
    %1 = vector.extract_strided_slice %0 {offsets = [0, 0], sizes = [1, 128], strides = [1, 1]} : vector<5x128xf32> to vector<1x128xf32>
    %2 = vector.extract_strided_slice %0 {offsets = [1, 0], sizes = [1, 128], strides = [1, 1]} : vector<5x128xf32> to vector<1x128xf32>
    %3 = vector.extract_strided_slice %0 {offsets = [2, 0], sizes = [1, 128], strides = [1, 1]} : vector<5x128xf32> to vector<1x128xf32>
    %4 = vector.extract_strided_slice %0 {offsets = [3, 0], sizes = [1, 128], strides = [1, 1]} : vector<5x128xf32> to vector<1x128xf32>
    %5 = vector.extract_strided_slice %0 {offsets = [4, 0], sizes = [1, 128], strides = [1, 1]} : vector<5x128xf32> to vector<1x128xf32>
    %c0_1 = arith.constant 0 : index
    %c0_2 = arith.constant 0 : index
    %6 = vector.load %arg1[%c0_1, %c0_2] : memref<16x1xf32, #tpu.memory_space<vmem>>, vector<16x1xf32>
    %cst = arith.constant 2.550000e+02 : f32
    %7 = vector.broadcast %cst : f32 to vector<16x1xf32>
    %8 = arith.minimumf %6, %7 : vector<16x1xf32>
    %9 = vector.broadcast %8 : vector<16x1xf32> to vector<16x128xf32>
    %10 = vector.broadcast %1 : vector<1x128xf32> to vector<16x128xf32>
    %11 = arith.mulf %9, %10 : vector<16x128xf32>
    %12 = vector.broadcast %2 : vector<1x128xf32> to vector<16x128xf32>
    %13 = arith.addf %11, %12 : vector<16x128xf32>
    %cst_3 = arith.constant 0.000000e+00 : f32
    %14 = vector.broadcast %cst_3 : f32 to vector<16x128xf32>
    %15 = arith.maximumf %13, %14 : vector<16x128xf32>
    %c0_4 = arith.constant 0 : index
    %c0_5 = arith.constant 0 : index
    %16 = vector.load %arg3[%c0_4, %c0_5] : memref<128x128xf32, #tpu.memory_space<vmem>>, vector<128x128xf32>
    %cst_6 = arith.constant dense<0.000000e+00> : vector<16x128xf32>
    %17 = tpu.matmul %15, %16, %cst_6 {dimension_numbers = #tpu.dot_dimension_numbers<[1], [0], [0], [1], [0, 0, 1, 1], [], []>} : vector<16x128xf32>, vector<128x128xf32>, vector<16x128xf32> -> vector<16x128xf32>
    %18 = vector.broadcast %3 : vector<1x128xf32> to vector<16x128xf32>
    %19 = arith.addf %17, %18 : vector<16x128xf32>
    %cst_7 = arith.constant dense<0.000000e+00> : vector<16xf32>
    %20 = vector.multi_reduction <add>, %19, %cst_7 [1] : vector<16x128xf32> to vector<16xf32>
    %21 = vector.shape_cast %20 : vector<16xf32> to vector<16x1xf32>
    %cst_8 = arith.constant 3.125000e-02 : f32
    %22 = vector.broadcast %cst_8 : f32 to vector<16x1xf32>
    %23 = arith.mulf %21, %22 : vector<16x1xf32>
    %24 = arith.mulf %19, %19 : vector<16x128xf32>
    %cst_9 = arith.constant dense<0.000000e+00> : vector<16xf32>
    %25 = vector.multi_reduction <add>, %24, %cst_9 [1] : vector<16x128xf32> to vector<16xf32>
    %26 = vector.shape_cast %25 : vector<16xf32> to vector<16x1xf32>
    %cst_10 = arith.constant 3.125000e-02 : f32
    %27 = vector.broadcast %cst_10 : f32 to vector<16x1xf32>
    %28 = arith.mulf %26, %27 : vector<16x1xf32>
    %29 = arith.mulf %23, %23 : vector<16x1xf32>
    %30 = arith.subf %28, %29 : vector<16x1xf32>
    %cst_11 = arith.constant 0.000000e+00 : f32
    %31 = vector.broadcast %cst_11 : f32 to vector<16x1xf32>
    %32 = arith.maximumf %30, %31 : vector<16x1xf32>
    %33 = vector.broadcast %23 : vector<16x1xf32> to vector<16x128xf32>
    %34 = arith.subf %19, %33 : vector<16x128xf32>
    %cst_12 = arith.constant 9.99999974E-6 : f32
    %35 = vector.broadcast %cst_12 : f32 to vector<16x1xf32>
    %36 = arith.addf %32, %35 : vector<16x1xf32>
    %37 = math.rsqrt %36 : vector<16x1xf32>
    %38 = vector.broadcast %37 : vector<16x1xf32> to vector<16x128xf32>
    %39 = arith.mulf %34, %38 : vector<16x128xf32>
    %40 = vector.broadcast %4 : vector<1x128xf32> to vector<16x128xf32>
    %41 = arith.mulf %39, %40 : vector<16x128xf32>
    %42 = vector.broadcast %5 : vector<1x128xf32> to vector<16x128xf32>
    %43 = arith.addf %41, %42 : vector<16x128xf32>
    %c0_13 = arith.constant 0 : index
    %c0_14 = arith.constant 0 : index
    %44 = vector.load %arg4[%c0_13, %c0_14] : memref<16x128xf32, #tpu.memory_space<vmem>>, vector<16x128xf32>
    tpu.vector_store %arg4[%c0_13, %c0_14], %43 {strides = array<i32>} : memref<16x128xf32, #tpu.memory_space<vmem>>, vector<16x128xf32>,
    return
  }
  func.func @transform_0(%arg0: i32) -> (i32, i32) {
    %c0_i32 = arith.constant 0 : i32
    %c0_i32_0 = arith.constant 0 : i32
    return %arg0, %c0_i32 : i32, i32
  }
  func.func @transform_1(%arg0: i32) -> (i32, i32) {
    %c0_i32 = arith.constant 0 : i32
    %c0_i32_0 = arith.constant 0 : i32
    %c0_i32_1 = arith.constant 0 : i32
    return %c0_i32, %c0_i32_0 : i32, i32
  }
  func.func @transform_2(%arg0: i32) -> (i32, i32) {
    %c0_i32 = arith.constant 0 : i32
    %c0_i32_0 = arith.constant 0 : i32
    %c0_i32_1 = arith.constant 0 : i32
    return %c0_i32, %c0_i32_0 : i32, i32
  }
  func.func @transform_3(%arg0: i32) -> (i32, i32) {
    %c0_i32 = arith.constant 0 : i32
    %c0_i32_0 = arith.constant 0 : i32
    return %arg0, %c0_i32 : i32, i32
  }
}

</mosaic_0001>

<bundles_post_ra>
// kernel: tpu_custom_call.1
= control target key start
LH: loop header
LB: loop body
LE: loop exit
PB: predicated region body
PF: predicated region fallthrough
CT: control target
= control target key end

     0   :  { %8 = vsyncpa [#allocation3], 0  ;;  %s419_s0 = inlined_call_operand.vmem [shape: f32[16,1], index: 0, kind: input, shape index: {}]   ;;  %s420_s1 = inlined_call_operand.vmem [shape: f32[5,128], index: 1, kind: input, shape index: {}]   ;;  %s421_s2 = inlined_call_operand.hbm [shape: f32[128,128], index: 2, kind: input, shape index: {}]   ;;  %s422_s3 = inlined_call_operand.hbm [shape: f32[16,128], index: 3, kind: output, shape index: {}]  }
   0x1   :  { %9 = vsyncpa [#allocation4], 0  ;;  %s355_s12 = smov [#allocation2]   ;;  %s307_s16 = scalar_lea.hbm %s421_s2, 2048 }
   0x2   :  { %s19_s13 = sshll.u32 %s355_s12, 4  ;;  %p308_p0 = scmp.ne.s32.totalorder %s421_s2, %s307_s16  ;;  %s20_s13 = int_to_ptr.vmem [resolvable:$true] %s19_s13 }
   0x3   :  { %p311_p1 = scmp.lt.u32.totalorder %s307_s16, %s421_s2 }
   0x5   :  { %p313_p2 = pnand %p311_p1, %p308_p0 }
   0x7   :  { %316 = shalt.err (!%p313_p2)
}
   0x8   :  { %s317_s21 = scalar_lea.vmem %s20_s13, 2048  ;;  %p322_p4 = scmp.lt.s32.totalorder %s20_s13, %s20_s13 }
   0x9   :  { %p318_p3 = scmp.ne.s32.totalorder %s20_s13, %s317_s21  ;;  %p323_p5 = scmp.lt.s32.totalorder %s317_s21, %s317_s21 }
   0xb   :  { %p324_p6 = por %p323_p5, %p322_p4 }
   0xd   :  { %p325_p7 = pnand %p324_p6, %p318_p3 }
   0xf   :  { %328 = shalt.err (!%p325_p7)
}
  0x10   :  { %s356_s22 = smov 128   ;;  %s357_s23 = smov 8  }
  0x11   :  { %25 = dma.hbm_to_vmem [thread:$0]  %s421_s2, 2048, %s20_s13, [#allocation3], %s356_s22, %s356_s22, %s357_s23  }
  0x12   :  { %351 = dma.done.wait [#allocation3], 2048  }
  0x13   :  { %352 = vsyncadd [#allocation3], 4294965248  ;;  %v358_v0 = vmov 0   ;;  %v30_v1 = vld [vmem:[%s419_s0] sm:$0xff]  ;;  %v31_v2 = vld [vmem:[%s419_s0 + $0x8] sm:$0xff]  ;;  %v44_v29 = vlaneseq }
  0x14   :  { %302 = vset.pattern.permute.xlu0 %v358_v0  ;;  %v58_v3 = vld [vmem:[#allocation2] sm:$0xff]  ;;  %v32_v4 = vmin.f32 %v30_v1, 255.0  ;;  %v59_v5 = vld [vmem:[#allocation2 + $0x8] sm:$0xff]  ;;  %v60_v6 = vld [vmem:[#allocation2 + $0x10] sm:$0xff]  ;;  %v33_v10 = vmin.f32 %v31_v2, 255.0 }
  0x15   :  { %v61_v7 = vld [vmem:[#allocation2 + $0x18] sm:$0xff]  ;;  %v265_v8 = vpack.c.bf16 %v59_v5, %v58_v3  ;;  %v62_v11 = vld [vmem:[#allocation2 + $0x20] sm:$0xff]  ;;  %v63_v12 = vld [vmem:[#allocation2 + $0x28] sm:$0xff]  ;;  %v45_v30 = vshrl.u32 %v44_v29, 7 }
  0x16   :  { %v269_v9 = vpack.c.bf16 %v61_v7, %v60_v6  ;;  %36 = vperm.xlu0 %302, %v32_v4   ;;  %v273_v13 = vpack.c.bf16 %v63_v12, %v62_v11  ;;  %v64_v14 = vld [vmem:[#allocation2 + $0x30] sm:$0xff]  ;;  %v65_v15 = vld [vmem:[#allocation2 + $0x38] sm:$0xff]  ;;  %v66_v17 = vld [vmem:[#allocation2 + $0x40] sm:$0xff] }
  0x17   :  { %266 = vmatprep.subr.bf16.mxu0 %v265_v8  ;;  %v277_v16 = vpack.c.bf16 %v65_v15, %v64_v14  ;;  %v67_v18 = vld [vmem:[#allocation2 + $0x48] sm:$0xff]  ;;  %v68_v20 = vld [vmem:[#allocation2 + $0x50] sm:$0xff]  ;;  %v69_v21 = vld [vmem:[#allocation2 + $0x58] sm:$0xff]  ;;  %v46_v31 = vsub.s32 0, %v45_v30  ;;  %v52_v33 = vsub.s32 1, %v45_v30  ;;  %v76_v44 = vsub.s32 2, %v45_v30 }
  0x18   :  { %268 = vmatpush3.bf16.msra.mxu0 %v265_v8  ;;  %v281_v19 = vpack.c.bf16 %v67_v18, %v66_v17  ;;  %v285_v22 = vpack.c.bf16 %v69_v21, %v68_v20  ;;  %v70_v23 = vld [vmem:[#allocation2 + $0x60] sm:$0xff]  ;;  %v71_v24 = vld [vmem:[#allocation2 + $0x68] sm:$0xff]  ;;  %v72_v26 = vld [vmem:[#allocation2 + $0x70] sm:$0xff]  ;;  %v183_v4 = vsub.s32 3, %v45_v30  ;;  %v189_v5 = vsub.s32 4, %v45_v30 }
  0x19   :  { %270 = vmatprep.subr.bf16.mxu0 %v269_v9  ;;  %v289_v25 = vpack.c.bf16 %v71_v24, %v70_v23  ;;  %v73_v27 = vld [vmem:[#allocation2 + $0x78] sm:$0xff]  ;;  %v29_v32 = vld [vmem:[%s420_s1] sm:$0x1f]  ;;  %s359_s1 = smov [#allocation5]  }
  0x1a   :  { %41 = vperm.xlu0 %302, %v33_v10   ;;  %v293_v28 = vpack.c.bf16 %v73_v27, %v72_v26  ;;  %v47_v34 = vrot.slane %v29_v32, %v46_v31  ;;  %v53_v35 = vrot.slane %v29_v32, %v52_v33  ;;  %v77_v45 = vrot.slane %v29_v32, %v76_v44  ;;  %s200_s30 = sshll.u32 %s359_s1, 4  ;;  %s201_s30 = int_to_ptr.vmem [resolvable:$true] %s200_s30 }
  0x1b   :  { %v184_v6 = vrot.slane %v29_v32, %v183_v4  ;;  %v190_v11 = vrot.slane %v29_v32, %v189_v5  ;;  %s329_s4 = scalar_lea.vmem %s201_s30, 256  ;;  %p334_p9 = scmp.lt.s32.totalorder %s201_s30, %s201_s30 }
  0x1c   :  { %272 = vmatpush3.bf16.msra.mxu0 %v269_v9  ;;  %p330_p8 = scmp.ne.s32.totalorder %s201_s30, %s329_s4  ;;  %p335_p10 = scmp.lt.s32.totalorder %s329_s4, %s329_s4 }
  0x1d   :  { %274 = vmatprep.subr.bf16.mxu0 %v273_v13 }
  0x1e   :  { %p336_p11 = por %p335_p10, %p334_p9 }
  0x20   :  { %276 = vmatpush3.bf16.msra.mxu0 %v273_v13  ;;  %p337_p12 = pnand %p336_p11, %p330_p8 }
  0x21   :  { %278 = vmatprep.subr.bf16.mxu0 %v277_v16 }
  0x24   :  { %280 = vmatpush3.bf16.msra.mxu0 %v277_v16 }
  0x25   :  { %282 = vmatprep.subr.bf16.mxu0 %v281_v19 }
  0x28   :  { %284 = vmatpush3.bf16.msra.mxu0 %v281_v19 }
  0x29   :  { %286 = vmatprep.subr.bf16.mxu0 %v285_v22 }
  0x2c   :  { %288 = vmatpush3.bf16.msra.mxu0 %v285_v22 }
  0x2d   :  { %290 = vmatprep.subr.bf16.mxu0 %v289_v25 }
  0x30   :  { %292 = vmatpush3.bf16.msra.mxu0 %v289_v25 }
  0x31   :  { %294 = vmatprep.subr.bf16.mxu0 %v293_v28 }
  0x34   :  { %296 = vmatpush3.bf16.msra.mxu0 %v293_v28 }
  0x95   :  { %v37_v36 = vpop.permute.xlu0 %36 }
  0x96   :  { %v48_v37 = vmul.f32 %v47_v34, %v37_v36 }
  0x98   :  { %v54_v38 = vadd.f32 %v53_v35, %v48_v37 }
  0x99   :  { %v42_v39 = vpop.permute.xlu0 %41 }
  0x9a   :  { %v49_v40 = vmul.f32 %v47_v34, %v42_v39  ;;  %v56_v41 = vmax.f32 %v54_v38, 0.0 }
  0x9c   :  { %v55_v42 = vadd.f32 %v53_v35, %v49_v40  ;;  %262 = vmatprep.mubr.f32.mxu0 %v56_v41 }
  0x9e   :  { %v57_v43 = vmax.f32 %v55_v42, 0.0 }
  0xa0   :  { %263 = vmatmul.mubr.f32.vlgmr.msra.gmra.mrb[0].mxu0 %v57_v43 }
 0x173   :  { %v264_v46 = vpop.f32.mrb[0].mxu0 }
 0x174   :  { %v150_v47 = vadd.f32 %v264_v46, %v77_v45  ;;  %v144_v48 = vpop.f32.mrb[1].mxu0 }
 0x175   :  { %v145_v49 = vadd.f32 %v144_v48, %v77_v45 }
 0x176   :  { %155 = vadd.xlane.f32.xlu1 %v150_v47  ;;  %v160_v51 = vmul.f32 %v150_v47, %v150_v47 }
 0x177   :  { %v159_v50 = vmul.f32 %v145_v49, %v145_v49 }
 0x179   :  { %161 = vadd.xlane.f32.xlu0 %v159_v50 }
 0x17a   :  { %153 = vadd.xlane.f32.xlu1 %v145_v49 }
 0x17e   :  { %163 = vadd.xlane.f32.xlu1 %v160_v51 }
 0x203   :  { %v156_v52 = vpop.xlane.xlu1 %155 }
 0x204   :  { %v158_v55 = vmul.f32 0.03125, %v156_v52 }
 0x206   :  { %v162_v53 = vpop.xlane.xlu0 %161  ;;  %v168_v60 = vmul.f32 %v158_v55, %v158_v55  ;;  %v174_v9 = vsub.f32 %v150_v47, %v158_v55 }
 0x207   :  { %v154_v54 = vpop.xlane.xlu1 %153  ;;  %v165_v57 = vmul.f32 0.03125, %v162_v53 }
 0x208   :  { %v157_v56 = vmul.f32 0.03125, %v154_v54 }
 0x20a   :  { %v167_v58 = vmul.f32 %v157_v56, %v157_v56  ;;  %v173_v7 = vsub.f32 %v145_v49, %v157_v56 }
 0x20b   :  { %v164_v59 = vpop.xlane.xlu1 %163 }
 0x20c   :  { %v169_v61 = vsub.f32 %v165_v57, %v167_v58  ;;  %v166_v62 = vmul.f32 0.03125, %v164_v59 }
 0x20e   :  { %v171_v63 = vmax.f32 %v169_v61, 0.0  ;;  %v170_v0 = vsub.f32 %v166_v62, %v168_v60 }
 0x210   :  { %v175_v1 = vadd.f32 1e-05, %v171_v63  ;;  %v172_v2 = vmax.f32 %v170_v0, 0.0 }
 0x212   :  { %303 = vrsqrt.f32 %v175_v1  ;;  %v176_v3 = vadd.f32 1e-05, %v172_v2 }
 0x214   :  { %305 = vrsqrt.f32 %v176_v3 }
 0x21c   :  { %v304_v8 = vpop.eup %303 }
 0x21d   :  { %v179_v10 = vmul.f32 %v304_v8, %v173_v7 }
 0x21e   :  { %v306_v12 = vpop.eup %305 }
 0x21f   :  { %v185_v13 = vmul.f32 %v184_v6, %v179_v10  ;;  %v180_v14 = vmul.f32 %v306_v12, %v174_v9 }
 0x221   :  { %v186_v15 = vmul.f32 %v184_v6, %v180_v14  ;;  %v191_v16 = vadd.f32 %v190_v11, %v185_v13 }
 0x223   :  { %v192_v17 = vadd.f32 %v190_v11, %v186_v15  ;;  %193 = vst [vmem:[#allocation5] sm:$0xff] %v191_v16 }
 0x225   :  { %194 = vst [vmem:[#allocation5 + $0x8] sm:$0xff] %v192_v17 }
 0x226   :  { %340 = shalt.err (!%p337_p12)
}
 0x227   :  { %s341_s7 = scalar_lea.hbm %s422_s3, 256 }
 0x228   :  { %p342_p13 = scmp.ne.s32.totalorder %s422_s3, %s341_s7  ;;  %p345_p0 = scmp.lt.u32.totalorder %s341_s7, %s422_s3 }
 0x22a   :  { %p347_p1 = pnand %p345_p0, %p342_p13 }
 0x22c   :  { %350 = shalt.err (!%p347_p1)
}
 0x22d   :  { %206 = dma.vmem_to_hbm [thread:$0]  %s201_s30, 256, %s422_s3, [#allocation4], %s356_s22, %s356_s22, %s357_s23  }
 0x22e   :  { %353 = dma.done.wait [#allocation4], 256  }
 0x22f   :  { %354 = vsyncadd [#allocation4], 4294967040 }
 0x230   :  { %210 = vsyncpa [#allocation3], 1 }
 0x231   :  { %211 = vsyncpa [#allocation4], 1 }

// kernel: tpu_custom_call.1
= control target key start
LH: loop header
LB: loop body
LE: loop exit
PB: predicated region body
PF: predicated region fallthrough
CT: control target
= control target key end

     0   :  { %8 = vsyncpa [#allocation3], 0  ;;  %s419_s0 = inlined_call_operand.vmem [shape: f32[16,1], index: 0, kind: input, shape index: {}]   ;;  %s420_s1 = inlined_call_operand.vmem [shape: f32[5,128], index: 1, kind: input, shape index: {}]   ;;  %s421_s2 = inlined_call_operand.hbm [shape: f32[128,128], index: 2, kind: input, shape index: {}]   ;;  %s422_s3 = inlined_call_operand.hbm [shape: f32[16,128], index: 3, kind: output, shape index: {}]  }
   0x1   :  { %9 = vsyncpa [#allocation4], 0  ;;  %s355_s12 = smov [#allocation2]   ;;  %s307_s16 = scalar_lea.hbm %s421_s2, 2048 }
   0x2   :  { %s19_s13 = sshll.u32 %s355_s12, 4  ;;  %p308_p0 = scmp.ne.s32.totalorder %s421_s2, %s307_s16  ;;  %s20_s13 = int_to_ptr.vmem [resolvable:$true] %s19_s13 }
   0x3   :  { %p311_p1 = scmp.lt.u32.totalorder %s307_s16, %s421_s2 }
   0x5   :  { %p313_p2 = pnand %p311_p1, %p308_p0 }
   0x7   :  { %316 = shalt.err (!%p313_p2)
}
   0x8   :  { %s317_s21 = scalar_lea.vmem %s20_s13, 2048  ;;  %p322_p4 = scmp.lt.s32.totalorder %s20_s13, %s20_s13 }
   0x9   :  { %p318_p3 = scmp.ne.s32.totalorder %s20_s13, %s317_s21  ;;  %p323_p5 = scmp.lt.s32.totalorder %s317_s21, %s317_s21 }
   0xb   :  { %p324_p6 = por %p323_p5, %p322_p4 }
   0xd   :  { %p325_p7 = pnand %p324_p6, %p318_p3 }
   0xf   :  { %328 = shalt.err (!%p325_p7)
}
  0x10   :  { %s356_s22 = smov 128   ;;  %s357_s23 = smov 8  }
  0x11   :  { %25 = dma.hbm_to_vmem [thread:$0]  %s421_s2, 2048, %s20_s13, [#allocation3], %s356_s22, %s356_s22, %s357_s23  }
  0x12   :  { %351 = dma.done.wait [#allocation3], 2048  }
  0x13   :  { %352 = vsyncadd [#allocation3], 4294965248  ;;  %v358_v0 = vmov 0   ;;  %v30_v1 = vld [vmem:[%s419_s0] sm:$0xff]  ;;  %v31_v2 = vld [vmem:[%s419_s0 + $0x8] sm:$0xff]  ;;  %v44_v29 = vlaneseq }
  0x14   :  { %302 = vset.pattern.permute.xlu0 %v358_v0  ;;  %v58_v3 = vld [vmem:[#allocation2] sm:$0xff]  ;;  %v32_v4 = vmin.f32 %v30_v1, 255.0  ;;  %v59_v5 = vld [vmem:[#allocation2 + $0x8] sm:$0xff]  ;;  %v60_v6 = vld [vmem:[#allocation2 + $0x10] sm:$0xff]  ;;  %v33_v10 = vmin.f32 %v31_v2, 255.0 }
  0x15   :  { %v61_v7 = vld [vmem:[#allocation2 + $0x18] sm:$0xff]  ;;  %v265_v8 = vpack.c.bf16 %v59_v5, %v58_v3  ;;  %v62_v11 = vld [vmem:[#allocation2 + $0x20] sm:$0xff]  ;;  %v63_v12 = vld [vmem:[#allocation2 + $0x28] sm:$0xff]  ;;  %v45_v30 = vshrl.u32 %v44_v29, 7 }
  0x16   :  { %v269_v9 = vpack.c.bf16 %v61_v7, %v60_v6  ;;  %36 = vperm.xlu0 %302, %v32_v4   ;;  %v273_v13 = vpack.c.bf16 %v63_v12, %v62_v11  ;;  %v64_v14 = vld [vmem:[#allocation2 + $0x30] sm:$0xff]  ;;  %v65_v15 = vld [vmem:[#allocation2 + $0x38] sm:$0xff]  ;;  %v66_v17 = vld [vmem:[#allocation2 + $0x40] sm:$0xff] }
  0x17   :  { %266 = vmatprep.subr.bf16.mxu0 %v265_v8  ;;  %v277_v16 = vpack.c.bf16 %v65_v15, %v64_v14  ;;  %v67_v18 = vld [vmem:[#allocation2 + $0x48] sm:$0xff]  ;;  %v68_v20 = vld [vmem:[#allocation2 + $0x50] sm:$0xff]  ;;  %v69_v21 = vld [vmem:[#allocation2 + $0x58] sm:$0xff]  ;;  %v46_v31 = vsub.s32 0, %v45_v30  ;;  %v52_v33 = vsub.s32 1, %v45_v30  ;;  %v76_v44 = vsub.s32 2, %v45_v30 }
  0x18   :  { %268 = vmatpush3.bf16.msra.mxu0 %v265_v8  ;;  %v281_v19 = vpack.c.bf16 %v67_v18, %v66_v17  ;;  %v285_v22 = vpack.c.bf16 %v69_v21, %v68_v20  ;;  %v70_v23 = vld [vmem:[#allocation2 + $0x60] sm:$0xff]  ;;  %v71_v24 = vld [vmem:[#allocation2 + $0x68] sm:$0xff]  ;;  %v72_v26 = vld [vmem:[#allocation2 + $0x70] sm:$0xff]  ;;  %v183_v4 = vsub.s32 3, %v45_v30  ;;  %v189_v5 = vsub.s32 4, %v45_v30 }
  0x19   :  { %270 = vmatprep.subr.bf16.mxu0 %v269_v9  ;;  %v289_v25 = vpack.c.bf16 %v71_v24, %v70_v23  ;;  %v73_v27 = vld [vmem:[#allocation2 + $0x78] sm:$0xff]  ;;  %v29_v32 = vld [vmem:[%s420_s1] sm:$0x1f]  ;;  %s359_s1 = smov [#allocation5]  }
  0x1a   :  { %41 = vperm.xlu0 %302, %v33_v10   ;;  %v293_v28 = vpack.c.bf16 %v73_v27, %v72_v26  ;;  %v47_v34 = vrot.slane %v29_v32, %v46_v31  ;;  %v53_v35 = vrot.slane %v29_v32, %v52_v33  ;;  %v77_v45 = vrot.slane %v29_v32, %v76_v44  ;;  %s200_s30 = sshll.u32 %s359_s1, 4  ;;  %s201_s30 = int_to_ptr.vmem [resolvable:$true] %s200_s30 }
  0x1b   :  { %v184_v6 = vrot.slane %v29_v32, %v183_v4  ;;  %v190_v11 = vrot.slane %v29_v32, %v189_v5  ;;  %s329_s4 = scalar_lea.vmem %s201_s30, 256  ;;  %p334_p9 = scmp.lt.s32.totalorder %s201_s30, %s201_s30 }
  0x1c   :  { %272 = vmatpush3.bf16.msra.mxu0 %v269_v9  ;;  %p330_p8 = scmp.ne.s32.totalorder %s201_s30, %s329_s4  ;;  %p335_p10 = scmp.lt.s32.totalorder %s329_s4, %s329_s4 }
  0x1d   :  { %274 = vmatprep.subr.bf16.mxu0 %v273_v13 }
  0x1e   :  { %p336_p11 = por %p335_p10, %p334_p9 }
  0x20   :  { %276 = vmatpush3.bf16.msra.mxu0 %v273_v13  ;;  %p337_p12 = pnand %p336_p11, %p330_p8 }
  0x21   :  { %278 = vmatprep.subr.bf16.mxu0 %v277_v16 }
  0x24   :  { %280 = vmatpush3.bf16.msra.mxu0 %v277_v16 }
  0x25   :  { %282 = vmatprep.subr.bf16.mxu0 %v281_v19 }
  0x28   :  { %284 = vmatpush3.bf16.msra.mxu0 %v281_v19 }
  0x29   :  { %286 = vmatprep.subr.bf16.mxu0 %v285_v22 }
  0x2c   :  { %288 = vmatpush3.bf16.msra.mxu0 %v285_v22 }
  0x2d   :  { %290 = vmatprep.subr.bf16.mxu0 %v289_v25 }
  0x30   :  { %292 = vmatpush3.bf16.msra.mxu0 %v289_v25 }
  0x31   :  { %294 = vmatprep.subr.bf16.mxu0 %v293_v28 }
  0x34   :  { %296 = vmatpush3.bf16.msra.mxu0 %v293_v28 }
  0x95   :  { %v37_v36 = vpop.permute.xlu0 %36 }
  0x96   :  { %v48_v37 = vmul.f32 %v47_v34, %v37_v36 }
  0x98   :  { %v54_v38 = vadd.f32 %v53_v35, %v48_v37 }
  0x99   :  { %v42_v39 = vpop.permute.xlu0 %41 }
  0x9a   :  { %v49_v40 = vmul.f32 %v47_v34, %v42_v39  ;;  %v56_v41 = vmax.f32 %v54_v38, 0.0 }
  0x9c   :  { %v55_v42 = vadd.f32 %v53_v35, %v49_v40  ;;  %262 = vmatprep.mubr.f32.mxu0 %v56_v41 }
  0x9e   :  { %v57_v43 = vmax.f32 %v55_v42, 0.0 }
  0xa0   :  { %263 = vmatmul.mubr.f32.vlgmr.msra.gmra.mrb[0].mxu0 %v57_v43 }
 0x173   :  { %v264_v46 = vpop.f32.mrb[0].mxu0 }
 0x174   :  { %v150_v47 = vadd.f32 %v264_v46, %v77_v45  ;;  %v144_v48 = vpop.f32.mrb[1].mxu0 }
 0x175   :  { %v145_v49 = vadd.f32 %v144_v48, %v77_v45 }
 0x176   :  { %155 = vadd.xlane.f32.xlu1 %v150_v47  ;;  %v160_v51 = vmul.f32 %v150_v47, %v150_v47 }
 0x177   :  { %v159_v50 = vmul.f32 %v145_v49, %v145_v49 }
 0x179   :  { %161 = vadd.xlane.f32.xlu0 %v159_v50 }
 0x17a   :  { %153 = vadd.xlane.f32.xlu1 %v145_v49 }
 0x17e   :  { %163 = vadd.xlane.f32.xlu1 %v160_v51 }
 0x203   :  { %v156_v52 = vpop.xlane.xlu1 %155 }
 0x204   :  { %v158_v55 = vmul.f32 0.03125, %v156_v52 }
 0x206   :  { %v162_v53 = vpop.xlane.xlu0 %161  ;;  %v168_v60 = vmul.f32 %v158_v55, %v158_v55  ;;  %v174_v9 = vsub.f32 %v150_v47, %v158_v55 }
 0x207   :  { %v154_v54 = vpop.xlane.xlu1 %153  ;;  %v165_v57 = vmul.f32 0.03125, %v162_v53 }
 0x208   :  { %v157_v56 = vmul.f32 0.03125, %v154_v54 }
 0x20a   :  { %v167_v58 = vmul.f32 %v157_v56, %v157_v56  ;;  %v173_v7 = vsub.f32 %v145_v49, %v157_v56 }
 0x20b   :  { %v164_v59 = vpop.xlane.xlu1 %163 }
 0x20c   :  { %v169_v61 = vsub.f32 %v165_v57, %v167_v58  ;;  %v166_v62 = vmul.f32 0.03125, %v164_v59 }
 0x20e   :  { %v171_v63 = vmax.f32 %v169_v61, 0.0  ;;  %v170_v0 = vsub.f32 %v166_v62, %v168_v60 }
 0x210   :  { %v175_v1 = vadd.f32 1e-05, %v171_v63  ;;  %v172_v2 = vmax.f32 %v170_v0, 0.0 }
 0x212   :  { %303 = vrsqrt.f32 %v175_v1  ;;  %v176_v3 = vadd.f32 1e-05, %v172_v2 }
 0x214   :  { %305 = vrsqrt.f32 %v176_v3 }
 0x21c   :  { %v304_v8 = vpop.eup %303 }
 0x21d   :  { %v179_v10 = vmul.f32 %v304_v8, %v173_v7 }
 0x21e   :  { %v306_v12 = vpop.eup %305 }
 0x21f   :  { %v185_v13 = vmul.f32 %v184_v6, %v179_v10  ;;  %v180_v14 = vmul.f32 %v306_v12, %v174_v9 }
 0x221   :  { %v186_v15 = vmul.f32 %v184_v6, %v180_v14  ;;  %v191_v16 = vadd.f32 %v190_v11, %v185_v13 }
 0x223   :  { %v192_v17 = vadd.f32 %v190_v11, %v186_v15  ;;  %193 = vst [vmem:[#allocation5] sm:$0xff] %v191_v16 }
 0x225   :  { %194 = vst [vmem:[#allocation5 + $0x8] sm:$0xff] %v192_v17 }
 0x226   :  { %340 = shalt.err (!%p337_p12)
}
 0x227   :  { %s341_s7 = scalar_lea.hbm %s422_s3, 256 }
 0x228   :  { %p342_p13 = scmp.ne.s32.totalorder %s422_s3, %s341_s7  ;;  %p345_p0 = scmp.lt.u32.totalorder %s341_s7, %s422_s3 }
 0x22a   :  { %p347_p1 = pnand %p345_p0, %p342_p13 }
 0x22c   :  { %350 = shalt.err (!%p347_p1)
}
 0x22d   :  { %206 = dma.vmem_to_hbm [thread:$0]  %s201_s30, 256, %s422_s3, [#allocation4], %s356_s22, %s356_s22, %s357_s23  }
 0x22e   :  { %353 = dma.done.wait [#allocation4], 256  }
 0x22f   :  { %354 = vsyncadd [#allocation4], 4294967040 }
 0x230   :  { %210 = vsyncpa [#allocation3], 1 }
 0x231   :  { %211 = vsyncpa [#allocation4], 1 }

</bundles_post_ra>
